<compile_context>
chip_gen: v5e
topology: v5e:2x2
jax: 0.10.0
libtpu: 0.0.40
codegen_flags: <defaults>
</compile_context>

<pallas_src>
import functools
import math

import jax
import jax.numpy as jnp
from jax.experimental import pallas as pl
from jax.experimental.pallas import tpu as pltpu


def _round_up(x, m):
    return ((x + m - 1) // m) * m


def _pick_divisor_tile(n, max_tile):
    """Largest tile that divides n, is a multiple of 8 and <= max_tile (else n)."""
    if n <= max_tile:
        return n
    for t in range(max_tile, 7, -1):
        if n % t == 0 and t % 8 == 0:
            return t
    return n  # no aligned divisor: one full-length tile


def ctrnn_window_kernel(xc_ref, xl_ref, w_ref, wi_ref, b_ref, itau_ref,
                        o_ref, xin_ref, *, ksize, tl, rc, pad):
    """CTRNN over the ksize-window ending at each position of the current tile.

    xc_ref  : (tl, Dp)       current sequence tile (Dp = lane-packed 4*d_model)
    xl_ref  : (pad, Dp)      last `pad` rows of the previous tile (lookback)
    w_ref   : (Dp, Dp) bf16  block-diagonal hidden->hidden weight
    wi_ref  : (Dp, Dp) bf16  block-diagonal input->hidden weight
    b_ref   : (1, Dp)  f32   bias (tiled per packed batch element)
    itau_ref: (1, Dp)  f32   1/tau (precomputed in the wrapper)
    o_ref   : (tl, Dp)       final hidden state of each window
    xin_ref : (pad+tl, Dp) f32 scratch: hoisted input projection; scratch row
              pad+m holds xin for tile-local position m, rows
              [pad-(ksize-1), pad) hold the lookback positions.
    """
    j = pl.program_id(1)
    w = w_ref[...]
    wi = wi_ref[...]
    b = b_ref[...]
    itau = itau_ref[...]

    # Lookback strip = the positions preceding this tile.  For the first tile
    # of every (batch-group, sequence) this reproduces get_K()'s zero left
    # padding (bias still applied, matching the reference).  Batch lives on
    # grid axis 0 / lanes, never rows, so no state leaks across batches.
    lb = xl_ref[...]
    lb = lb * (j > 0).astype(lb.dtype)
    xin_ref[0:pad, :] = (
        jnp.dot(lb.astype(jnp.bfloat16), wi, preferred_element_type=jnp.float32)
        + b)

    def chunk(base):
        # Hoisted input projection for this chunk's rows (off the serial chain).
        xc = xc_ref[pl.ds(base, rc), :].astype(jnp.bfloat16)
        xin_ref[pl.ds(pad + base, rc), :] = (
            jnp.dot(xc, wi, preferred_element_type=jnp.float32) + b)

        # Recurrence.  h0 = 0  =>  step 0 reduces to h = (1/tau) * relu(xin_0).
        h = itau * jnp.maximum(
            xin_ref[pl.ds(pad + base - (ksize - 1), rc), :], 0.0)
        for t in range(1, ksize):                       # ksize is small & static
            x_t = xin_ref[pl.ds(pad + base - (ksize - 1) + t, rc), :]
            pre = jnp.dot(h.astype(jnp.bfloat16), w,
                          preferred_element_type=jnp.float32) + x_t
            h = h + itau * (jnp.maximum(pre, 0.0) - h)  # h += 1/tau*(-h+relu(.))
        o_ref[pl.ds(base, rc), :] = h.astype(o_ref.dtype)

    n_chunks = tl // rc
    if n_chunks == 1:
        chunk(0)                                        # fully static slices
    else:
        @pl.loop(0, n_chunks)
        def _(c):
            chunk(pl.multiple_of(c * rc, rc))


def local_rnn_forward(x, params, ksize, *, max_seq_tile=2048, max_chunk=256):
    """LocalRNN.forward (CTRNN branch): (B, L, D) -> (B, L, D)."""
    B, L, D = x.shape
    assert ksize >= 1

    # ---- lane packing: `pack` batch elements side by side in the 128 lanes.
    pack = 128 // D if (D < 128 and 128 % D == 0) else 1
    Bp = _round_up(B, pack)
    if Bp != B:
        x = jnp.concatenate([x, jnp.zeros((Bp - B, L, D), x.dtype)], axis=0)
    G = Bp // pack
    Dp = pack * D
    xp = x.reshape(G, pack, L, D).transpose(0, 2, 1, 3).reshape(G, L, Dp)

    # Block-diagonal packed weights as bf16 MXU operands; bias / 1/tau tiled
    # and kept f32 (elementwise math stays f32 on every TPU generation).
    eye = jnp.eye(pack, dtype=jnp.float32)
    w_blk = jnp.kron(eye, params['weight'].astype(jnp.float32)).astype(jnp.bfloat16)
    wi_blk = jnp.kron(eye, params['input_weight'].astype(jnp.float32)).astype(jnp.bfloat16)
    b_blk = jnp.tile(params['bias'].astype(jnp.float32), (1, pack))
    itau_blk = jnp.tile(1.0 / params['tau'].astype(jnp.float32), (1, pack))

    # ---- tiling
    tl = _pick_divisor_tile(L, max_seq_tile)
    assert L % tl == 0
    assert ksize - 1 <= tl, "window lookback must fit within one sequence tile"
    n_seq = L // tl
    # Lookback strip rows: smallest multiple of 8 >= ksize-1 that sub-blocks the
    # tile; fall back to a full tile only if the tile itself is not 8-aligned.
    pb = _round_up(max(ksize - 1, 1), 8)
    if tl % 8 != 0 or pb > tl or tl % pb != 0:
        pb = tl
    ratio = tl // pb
    pad = pb
    # Recurrence row chunk: bounds the per-chunk live set to ~64 vregs.
    rc = _pick_divisor_tile(tl, max_chunk)

    cur_spec = pl.BlockSpec((None, tl, Dp), lambda g, j: (g, j, 0))
    prev_spec = pl.BlockSpec(
        (None, pb, Dp), lambda g, j: (g, jnp.maximum(j * ratio - 1, 0), 0))
    mat_spec = pl.BlockSpec((Dp, Dp), lambda g, j: (0, 0))
    row_spec = pl.BlockSpec((1, Dp), lambda g, j: (0, 0))
    out_spec = pl.BlockSpec((None, tl, Dp), lambda g, j: (g, j, 0))

    out = pl.pallas_call(
        functools.partial(ctrnn_window_kernel, ksize=ksize, tl=tl, rc=rc, pad=pad),
        out_shape=jax.ShapeDtypeStruct((G, L, Dp), x.dtype),
        grid=(G, n_seq),
        in_specs=[cur_spec, prev_spec, mat_spec, mat_spec, row_spec, row_spec],
        out_specs=out_spec,
        scratch_shapes=[pltpu.VMEM((pad + tl, Dp), jnp.float32)],
        compiler_params=pltpu.CompilerParams(
            dimension_semantics=("parallel", "parallel")),
        # Per-step VMEM is only a few MiB even at tl=2048, well under every
        # generation's default scoped limit -> no vmem_limit_bytes override.
    )(xp, xp, w_blk, wi_blk, b_blk, itau_blk)

    # Un-pack lanes back to (B, L, D).
    out = out.reshape(G, L, pack, D).transpose(0, 2, 1, 3).reshape(Bp, L, D)
    return out[:B]


# --------------------------- pure-JAX reference ------------------------------
def local_rnn_reference(x, params, ksize):
    """Mirrors LocalRNN.get_K + SimpleCTRNN (h0 = 0), final state per window."""
    B, L, D = x.shape
    zpad = jnp.zeros((B, ksize - 1, D), x.dtype)
    xp = jnp.concatenate([zpad, x], axis=1)                 # (B, L+K-1, D)
    h = jnp.zeros((B, L, D), jnp.float32)
    inv_tau = 1.0 / params['tau']
    for t in range(ksize):
        xt = xp[:, t:t + L, :]                              # t-th element of each window
        pre = h @ params['weight'] + xt @ params['input_weight'] + params['bias']
        h = h + inv_tau * (jnp.maximum(pre, 0.0) - h)
    return h


# --------------------------- parameter init ----------------------------------
def init_params(key, d_model):
    D = d_model
    k1, k2, k3, k4 = jax.random.split(key, 4)
    s = 1.0 / math.sqrt(D)
    # Forward semantics do not depend on the init distribution; scaled weights
    # and tau >= 0.5 keep the demo numerically tame.
    return dict(
        bias=(0.1 * jax.random.normal(k1, (1, D))).astype(jnp.float32),
        weight=(s * jax.random.normal(k2, (D, D))).astype(jnp.float32),
        input_weight=(s * jax.random.normal(k3, (D, D))).astype(jnp.float32),
        tau=(jnp.abs(jax.random.normal(k4, (1, D))) + 0.5).astype(jnp.float32),
    )


if __name__ == "__main__":
    # LocalRNN(input_dim=32, output_dim=32, rnn_type='CTRNN', ksize=3, dropout=0.0)
    d_model, ksize = 32, 3
    B, L = 2, 8

    key = jax.random.PRNGKey(0)
    pkey, xkey = jax.random.split(key)
    params = init_params(pkey, d_model)
    x = jax.random.normal(xkey, (B, L, d_model), dtype=jnp.float32)

    out = jax.block_until_ready(local_rnn_forward(x, params, ksize))
    ref = jax.block_until_ready(local_rnn_reference(x, params, ksize))

    assert out.shape == (B, L, d_model)
    assert bool(jnp.all(jnp.isfinite(out)))
    # bf16 MXU operands vs an all-f32 reference through a K-step matmul chain:
    # a few-percent tolerance still catches any real bug (wrong window,
    # lookback leak, packing error), all of which produce O(1) mismatches.
    tol = 1e-1 + 3e-2 * float(jnp.max(jnp.abs(ref)))
    max_err = float(jnp.max(jnp.abs(out - ref)))
    assert max_err < tol, f"mismatch vs pure-JAX reference: {max_err} (tol {tol})"
    print("KERNEL_OK")
</pallas_src>

<mosaic_0001>
module attributes {stable_mosaic.version = 11 : i64} {
  func.func @ctrnn_window_kernel(%arg0: i32, %arg1: i32, %arg2: memref<1x8x128xf32, #tpu.memory_space<vmem>>, %arg3: memref<1x8x128xf32, #tpu.memory_space<vmem>>, %arg4: memref<128x128xbf16, #tpu.memory_space<vmem>>, %arg5: memref<128x128xbf16, #tpu.memory_space<vmem>>, %arg6: memref<1x128xf32, #tpu.memory_space<vmem>>, %arg7: memref<1x128xf32, #tpu.memory_space<vmem>>, %arg8: memref<1x8x128xf32, #tpu.memory_space<vmem>>, %arg9: memref<16x128xf32, #tpu.memory_space<vmem>>) attributes {dimension_semantics = [#tpu.dimension_semantics<parallel>, #tpu.dimension_semantics<parallel>], iteration_bounds = array<i64: 1, 1>, scalar_prefetch = 0 : i64, scratch_operands = 1 : i64, tpu.core_type = #tpu.core_type<tc>, window_params = [{transform_indices = @transform_0, window_bounds = array<i64: 1, 8, 128>}, {transform_indices = @transform_1, window_bounds = array<i64: 1, 8, 128>}, {pipeline_mode = #tpu.pipeline_mode<synchronous>, transform_indices = @transform_2, window_bounds = array<i64: 128, 128>}, {pipeline_mode = #tpu.pipeline_mode<synchronous>, transform_indices = @transform_3, window_bounds = array<i64: 128, 128>}, {pipeline_mode = #tpu.pipeline_mode<synchronous>, transform_indices = @transform_4, window_bounds = array<i64: 1, 128>}, {pipeline_mode = #tpu.pipeline_mode<synchronous>, transform_indices = @transform_5, window_bounds = array<i64: 1, 128>}, {transform_indices = @transform_6, window_bounds = array<i64: 1, 8, 128>}]} {
    %c0 = arith.constant 0 : index
    %c0_0 = arith.constant 0 : index
    %0 = vector.load %arg4[%c0, %c0_0] : memref<128x128xbf16, #tpu.memory_space<vmem>>, vector<128x128xbf16>
    %c0_1 = arith.constant 0 : index
    %c0_2 = arith.constant 0 : index
    %1 = vector.load %arg5[%c0_1, %c0_2] : memref<128x128xbf16, #tpu.memory_space<vmem>>, vector<128x128xbf16>
    %c0_3 = arith.constant 0 : index
    %c0_4 = arith.constant 0 : index
    %2 = vector.load %arg6[%c0_3, %c0_4] : memref<1x128xf32, #tpu.memory_space<vmem>>, vector<1x128xf32>
    %c0_5 = arith.constant 0 : index
    %c0_6 = arith.constant 0 : index
    %3 = vector.load %arg7[%c0_5, %c0_6] : memref<1x128xf32, #tpu.memory_space<vmem>>, vector<1x128xf32>
    %c0_7 = arith.constant 0 : index
    %c0_8 = arith.constant 0 : index
    %c0_9 = arith.constant 0 : index
    %4 = vector.load %arg3[%c0_7, %c0_8, %c0_9] : memref<1x8x128xf32, #tpu.memory_space<vmem>>, vector<1x8x128xf32>
    %5 = vector.shape_cast %4 : vector<1x8x128xf32> to vector<8x128xf32>
    %c0_i32 = arith.constant 0 : i32
    %6 = arith.cmpi sgt, %arg1, %c0_i32 : i32
    %7 = arith.extui %6 : i1 to i32
    %8 = arith.sitofp %7 : i32 to f32
    %9 = vector.broadcast %8 : f32 to vector<8x128xf32>
    %10 = arith.mulf %5, %9 : vector<8x128xf32>
    %11 = arith.truncf %10 : vector<8x128xf32> to vector<8x128xbf16>
    %cst = arith.constant dense<0.000000e+00> : vector<8x128xf32>
    %12 = tpu.matmul %11, %1, %cst {dimension_numbers = #tpu.dot_dimension_numbers<[1], [0], [0], [1], [0, 0, 1, 1], [], []>} : vector<8x128xbf16>, vector<128x128xbf16>, vector<8x128xf32> -> vector<8x128xf32>
    %13 = vector.broadcast %2 : vector<1x128xf32> to vector<8x128xf32>
    %14 = arith.addf %12, %13 : vector<8x128xf32>
    %c0_10 = arith.constant 0 : index
    %c0_11 = arith.constant 0 : index
    %15 = vector.load %arg9[%c0_10, %c0_11] : memref<16x128xf32, #tpu.memory_space<vmem>>, vector<8x128xf32>
    tpu.vector_store %arg9[%c0_10, %c0_11], %14 {strides = array<i32>} : memref<16x128xf32, #tpu.memory_space<vmem>>, vector<8x128xf32>,
    %c0_12 = arith.constant 0 : index
    %c0_13 = arith.constant 0 : index
    %c0_14 = arith.constant 0 : index
    %16 = vector.load %arg2[%c0_12, %c0_13, %c0_14] : memref<1x8x128xf32, #tpu.memory_space<vmem>>, vector<1x8x128xf32>
    %17 = vector.shape_cast %16 : vector<1x8x128xf32> to vector<8x128xf32>
    %18 = arith.truncf %17 : vector<8x128xf32> to vector<8x128xbf16>
    %cst_15 = arith.constant dense<0.000000e+00> : vector<8x128xf32>
    %19 = tpu.matmul %18, %1, %cst_15 {dimension_numbers = #tpu.dot_dimension_numbers<[1], [0], [0], [1], [0, 0, 1, 1], [], []>} : vector<8x128xbf16>, vector<128x128xbf16>, vector<8x128xf32> -> vector<8x128xf32>
    %20 = vector.broadcast %2 : vector<1x128xf32> to vector<8x128xf32>
    %21 = arith.addf %19, %20 : vector<8x128xf32>
    %c8 = arith.constant 8 : index
    %c0_16 = arith.constant 0 : index
    %22 = vector.load %arg9[%c8, %c0_16] : memref<16x128xf32, #tpu.memory_space<vmem>>, vector<8x128xf32>
    tpu.vector_store %arg9[%c8, %c0_16], %21 {strides = array<i32>} : memref<16x128xf32, #tpu.memory_space<vmem>>, vector<8x128xf32>,
    %c6 = arith.constant 6 : index
    %c0_17 = arith.constant 0 : index
    %23 = vector.load %arg9[%c6, %c0_17] : memref<16x128xf32, #tpu.memory_space<vmem>>, vector<8x128xf32>
    %cst_18 = arith.constant 0.000000e+00 : f32
    %24 = vector.broadcast %cst_18 : f32 to vector<8x128xf32>
    %25 = arith.maximumf %23, %24 : vector<8x128xf32>
    %26 = vector.broadcast %3 : vector<1x128xf32> to vector<8x128xf32>
    %27 = arith.mulf %26, %25 : vector<8x128xf32>
    %c7 = arith.constant 7 : index
    %c0_19 = arith.constant 0 : index
    %28 = vector.load %arg9[%c7, %c0_19] : memref<16x128xf32, #tpu.memory_space<vmem>>, vector<8x128xf32>
    %29 = arith.truncf %27 : vector<8x128xf32> to vector<8x128xbf16>
    %cst_20 = arith.constant dense<0.000000e+00> : vector<8x128xf32>
    %30 = tpu.matmul %29, %0, %cst_20 {dimension_numbers = #tpu.dot_dimension_numbers<[1], [0], [0], [1], [0, 0, 1, 1], [], []>} : vector<8x128xbf16>, vector<128x128xbf16>, vector<8x128xf32> -> vector<8x128xf32>
    %31 = arith.addf %30, %28 : vector<8x128xf32>
    %cst_21 = arith.constant 0.000000e+00 : f32
    %32 = vector.broadcast %cst_21 : f32 to vector<8x128xf32>
    %33 = arith.maximumf %31, %32 : vector<8x128xf32>
    %34 = arith.subf %33, %27 : vector<8x128xf32>
    %35 = vector.broadcast %3 : vector<1x128xf32> to vector<8x128xf32>
    %36 = arith.mulf %35, %34 : vector<8x128xf32>
    %37 = arith.addf %27, %36 : vector<8x128xf32>
    %c8_22 = arith.constant 8 : index
    %c0_23 = arith.constant 0 : index
    %38 = vector.load %arg9[%c8_22, %c0_23] : memref<16x128xf32, #tpu.memory_space<vmem>>, vector<8x128xf32>
    %39 = arith.truncf %37 : vector<8x128xf32> to vector<8x128xbf16>
    %cst_24 = arith.constant dense<0.000000e+00> : vector<8x128xf32>
    %40 = tpu.matmul %39, %0, %cst_24 {dimension_numbers = #tpu.dot_dimension_numbers<[1], [0], [0], [1], [0, 0, 1, 1], [], []>} : vector<8x128xbf16>, vector<128x128xbf16>, vector<8x128xf32> -> vector<8x128xf32>
    %41 = arith.addf %40, %38 : vector<8x128xf32>
    %cst_25 = arith.constant 0.000000e+00 : f32
    %42 = vector.broadcast %cst_25 : f32 to vector<8x128xf32>
    %43 = arith.maximumf %41, %42 : vector<8x128xf32>
    %44 = arith.subf %43, %37 : vector<8x128xf32>
    %45 = vector.broadcast %3 : vector<1x128xf32> to vector<8x128xf32>
    %46 = arith.mulf %45, %44 : vector<8x128xf32>
    %47 = arith.addf %37, %46 : vector<8x128xf32>
    %c0_26 = arith.constant 0 : index
    %c0_27 = arith.constant 0 : index
    %c0_28 = arith.constant 0 : index
    %48 = vector.load %arg8[%c0_26, %c0_27, %c0_28] : memref<1x8x128xf32, #tpu.memory_space<vmem>>, vector<1x8x128xf32>
    %49 = vector.shape_cast %48 : vector<1x8x128xf32> to vector<8x128xf32>
    %50 = vector.shape_cast %47 : vector<8x128xf32> to vector<1x8x128xf32>
    tpu.vector_store %arg8[%c0_26, %c0_27, %c0_28], %50 {strides = array<i32>} : memref<1x8x128xf32, #tpu.memory_space<vmem>>, vector<1x8x128xf32>,
    return
  }
  func.func @transform_0(%arg0: i32, %arg1: i32) -> (i32, i32, i32) {
    %c0_i32 = arith.constant 0 : i32
    %c0_i32_0 = arith.constant 0 : i32
    return %arg0, %arg1, %c0_i32 : i32, i32, i32
  }
  func.func @transform_1(%arg0: i32, %arg1: i32) -> (i32, i32, i32) {
    %c1_i32 = arith.constant 1 : i32
    %0 = arith.muli %arg1, %c1_i32 : i32
    %c1_i32_0 = arith.constant 1 : i32
    %1 = arith.subi %0, %c1_i32_0 : i32
    %c0_i32 = arith.constant 0 : i32
    %2 = arith.maxsi %1, %c0_i32 : i32
    %c0_i32_1 = arith.constant 0 : i32
    %c0_i32_2 = arith.constant 0 : i32
    return %arg0, %2, %c0_i32_1 : i32, i32, i32
  }
  func.func @transform_2(%arg0: i32, %arg1: i32) -> (i32, i32) {
    %c0_i32 = arith.constant 0 : i32
    %c0_i32_0 = arith.constant 0 : i32
    %c0_i32_1 = arith.constant 0 : i32
    return %c0_i32, %c0_i32_0 : i32, i32
  }
  func.func @transform_3(%arg0: i32, %arg1: i32) -> (i32, i32) {
    %c0_i32 = arith.constant 0 : i32
    %c0_i32_0 = arith.constant 0 : i32
    %c0_i32_1 = arith.constant 0 : i32
    return %c0_i32, %c0_i32_0 : i32, i32
  }
  func.func @transform_4(%arg0: i32, %arg1: i32) -> (i32, i32) {
    %c0_i32 = arith.constant 0 : i32
    %c0_i32_0 = arith.constant 0 : i32
    %c0_i32_1 = arith.constant 0 : i32
    return %c0_i32, %c0_i32_0 : i32, i32
  }
  func.func @transform_5(%arg0: i32, %arg1: i32) -> (i32, i32) {
    %c0_i32 = arith.constant 0 : i32
    %c0_i32_0 = arith.constant 0 : i32
    %c0_i32_1 = arith.constant 0 : i32
    return %c0_i32, %c0_i32_0 : i32, i32
  }
  func.func @transform_6(%arg0: i32, %arg1: i32) -> (i32, i32, i32) {
    %c0_i32 = arith.constant 0 : i32
    %c0_i32_0 = arith.constant 0 : i32
    return %arg0, %arg1, %c0_i32 : i32, i32, i32
  }
}

</mosaic_0001>

<bundles_post_ra>
// kernel: tpu_custom_call.1
= control target key start
LH: loop header
LB: loop body
LE: loop exit
PB: predicated region body
PF: predicated region fallthrough
CT: control target
= control target key end

     0   :  { %11 = vsyncpa [#allocation4], 0  ;;  %s607_s0 = inlined_call_operand.hbm [shape: f32[1,8,128], index: 0, kind: input, shape index: {}]   ;;  %s608_s1 = inlined_call_operand.hbm [shape: f32[1,8,128], index: 1, kind: input, shape index: {}]   ;;  %s609_s2 = inlined_call_operand.hbm [shape: bf16[128,128], index: 2, kind: input, shape index: {}]   ;;  %s610_s3 = inlined_call_operand.hbm [shape: bf16[128,128], index: 3, kind: input, shape index: {}]   ;;  %s611_s4 = inlined_call_operand.vmem [shape: f32[1,128], index: 4, kind: input, shape index: {}]   ;;  %s612_s5 = inlined_call_operand.vmem [shape: f32[1,128], index: 5, kind: input, shape index: {}]   ;;  %s613_s6 = inlined_call_operand.hbm [shape: f32[1,8,128], index: 6, kind: output, shape index: {}]  }
   0x1   :  { %12 = vsyncpa [#allocation7], 0 }
   0x2   :  { %13 = vsyncpa [#allocation10], 0  ;;  %s36_s23 = sshll.u32 %s608_s1, 4  ;;  %s37_s23 = int_to_ptr.hbm [resolvable:$true] %s36_s23 }
   0x3   :  { %14 = vsyncpa [#allocation5], 0  ;;  %s544_s24 = smov [#allocation6]   ;;  %s20_s28 = sshll.u32 %s607_s0, 4  ;;  %s21_s28 = int_to_ptr.hbm [resolvable:$true] %s20_s28 }
   0x4   :  { %s38_s25 = sshll.u32 %s544_s24, 4  ;;  %s545_s29 = smov [#allocation3]   ;;  %s39_s25 = int_to_ptr.vmem [resolvable:$true] %s38_s25 }
   0x5   :  { %41 = dma.hbm_to_vmem [thread:$0]  %s37_s23, 128, %s39_s25, [#allocation7]  }
   0x6   :  { %s22_s30 = sshll.u32 %s545_s29, 4  ;;  %s46_s9 = sshll.u32 %s609_s2, 4  ;;  %s23_s30 = int_to_ptr.vmem [resolvable:$true] %s22_s30  ;;  %s47_s9 = int_to_ptr.hbm [resolvable:$true] %s46_s9 }
   0x7   :  { %25 = dma.hbm_to_vmem [thread:$0]  %s21_s28, 128, %s23_s30, [#allocation4]  }
   0x8   :  { %s546_s1 = smov [#allocation8]   ;;  %s59_s13 = sshll.u32 %s610_s3, 4  ;;  %s60_s13 = int_to_ptr.hbm [resolvable:$true] %s59_s13 }
   0x9   :  { %s48_s10 = sshll.u32 %s546_s1, 4  ;;  %s547_s14 = smov 64   ;;  %s49_s10 = int_to_ptr.vmem [resolvable:$true] %s48_s10 }
   0xa   :  { %s548_s0 = smov 4   ;;  %s549_s15 = smov [#allocation9]  }
   0xb   :  { %54 = dma.hbm_to_vmem [thread:$0]  %s47_s9, 1024, %s49_s10, [#allocation7], %s547_s14, %s547_s14, %s548_s0  }
   0xc   :  { %s61_s16 = sshll.u32 %s549_s15, 4  ;;  %s62_s16 = int_to_ptr.vmem [resolvable:$true] %s61_s16 }
   0xd   :  { %67 = dma.hbm_to_vmem [thread:$0]  %s60_s13, 1024, %s62_s16, [#allocation10], %s547_s14, %s547_s14, %s548_s0  }
   0xe   :  { %536 = dma.done.wait [#allocation4], 128  }
   0xf   :  { %537 = vsyncadd [#allocation4], 4294967168 }
  0x10   :  { %538 = dma.done.wait [#allocation7], 1152  }
  0x11   :  { %539 = vsyncadd [#allocation7], 4294966144 }
  0x12   :  { %540 = dma.done.wait [#allocation10], 1024  }
  0x13   :  { %541 = vsyncadd [#allocation10], 4294966272  ;;  %v406_v0 = vld [vmem:[#allocation9 + $0x38] sm:$0xff]  ;;  %v405_v1 = vld [vmem:[#allocation9 + $0x30] sm:$0xff]  ;;  %s313_s21 = sshll.u32 %s613_s6, 4  ;;  %s314_s21 = int_to_ptr.hbm [resolvable:$true] %s313_s21 }
  0x14   :  { %183 = vmatpush.bf16.msra.mxu0 %v406_v0  ;;  %199 = vmatpush.bf16.msra.mxu1 %v406_v0  ;;  %v398_v2 = vld [vmem:[#allocation8 + $0x38] sm:$0xff]  ;;  %v397_v3 = vld [vmem:[#allocation8 + $0x30] sm:$0xff]  ;;  %v404_v4 = vld [vmem:[#allocation9 + $0x28] sm:$0xff] }
  0x15   :  { %269 = vmatpush.bf16.msra.mxu2 %v398_v2  ;;  %288 = vmatpush.bf16.msra.mxu3 %v398_v2  ;;  %v396_v5 = vld [vmem:[#allocation8 + $0x28] sm:$0xff]  ;;  %v403_v6 = vld [vmem:[#allocation9 + $0x20] sm:$0xff]  ;;  %v402_v8 = vld [vmem:[#allocation9 + $0x18] sm:$0xff] }
  0x16   :  { %v395_v7 = vld [vmem:[#allocation8 + $0x20] sm:$0xff]  ;;  %v401_v9 = vld [vmem:[#allocation9 + $0x10] sm:$0xff]  ;;  %v400_v10 = vld [vmem:[#allocation9 + $0x8] sm:$0xff] }
  0x17   :  { %v125_v11 = vld [vmem:[#allocation6] sm:$0xff]  ;;  %v399_v13 = vld [vmem:[#allocation9] sm:$0xff]  ;;  %v197_v14 = vld [vmem:[#allocation3] sm:$0xff] }
  0x18   :  { %184 = vmatpush.bf16.msra.mxu0 %v405_v1  ;;  %200 = vmatpush.bf16.msra.mxu1 %v405_v1  ;;  %v130_v12 = vmul.f32 0.0, %v125_v11  ;;  %v198_v16 = vpack.c.bf16 %v197_v14, %v197_v14  ;;  %v394_v17 = vld [vmem:[#allocation8 + $0x18] sm:$0xff]  ;;  %v393_v18 = vld [vmem:[#allocation8 + $0x10] sm:$0xff]  ;;  %v392_v19 = vld [vmem:[#allocation8 + $0x8] sm:$0xff] }
  0x19   :  { %270 = vmatpush.bf16.msra.mxu2 %v397_v3  ;;  %289 = vmatpush.bf16.msra.mxu3 %v397_v3  ;;  %v391_v20 = vld [vmem:[#allocation8] sm:$0xff] }
  0x1a   :  { %v131_v15 = vpack.c.bf16 %v130_v12, %v130_v12  ;;  %v414_v21 = vld [vmem:[%s611_s4] ss:$0 sm:$0xff]  ;;  %s550_s4 = smov [#allocation11]  }
  0x1b   :  { %v415_v28 = vld [vmem:[%s612_s5] ss:$0 sm:$0xff]  ;;  %s311_s5 = sshll.u32 %s550_s4, 4  ;;  %s312_s5 = int_to_ptr.vmem [resolvable:$true] %s311_s5 }
  0x1c   :  { %185 = vmatpush.bf16.msra.mxu0 %v404_v4  ;;  %201 = vmatpush.bf16.msra.mxu1 %v404_v4 }
  0x1d   :  { %271 = vmatpush.bf16.msra.mxu2 %v396_v5  ;;  %290 = vmatpush.bf16.msra.mxu3 %v396_v5 }
  0x20   :  { %186 = vmatpush.bf16.msra.mxu0 %v403_v6  ;;  %202 = vmatpush.bf16.msra.mxu1 %v403_v6 }
  0x21   :  { %272 = vmatpush.bf16.msra.mxu2 %v395_v7  ;;  %291 = vmatpush.bf16.msra.mxu3 %v395_v7 }
  0x24   :  { %187 = vmatpush.bf16.msra.mxu0 %v402_v8  ;;  %203 = vmatpush.bf16.msra.mxu1 %v402_v8 }
  0x25   :  { %273 = vmatpush.bf16.msra.mxu2 %v394_v17  ;;  %292 = vmatpush.bf16.msra.mxu3 %v394_v17 }
  0x28   :  { %188 = vmatpush.bf16.msra.mxu0 %v401_v9  ;;  %204 = vmatpush.bf16.msra.mxu1 %v401_v9 }
  0x29   :  { %274 = vmatpush.bf16.msra.mxu2 %v393_v18  ;;  %293 = vmatpush.bf16.msra.mxu3 %v393_v18 }
  0x2c   :  { %189 = vmatpush.bf16.msra.mxu0 %v400_v10  ;;  %205 = vmatpush.bf16.msra.mxu1 %v400_v10 }
  0x2d   :  { %275 = vmatpush.bf16.msra.mxu2 %v392_v19  ;;  %294 = vmatpush.bf16.msra.mxu3 %v392_v19 }
  0x30   :  { %190 = vmatpush.bf16.msra.mxu0 %v399_v13  ;;  %206 = vmatpush.bf16.msra.mxu1 %v399_v13 }
  0x31   :  { %276 = vmatpush.bf16.msra.mxu2 %v391_v20  ;;  %295 = vmatpush.bf16.msra.mxu3 %v391_v20 }
  0x33   :  { %191 = vmatmul.bf16.vlgmr.msra.gmra.mxu0 %v131_v15  ;;  %207 = vmatmul.bf16.vlgmr.msra.gmra.mxu1 %v198_v16 }
  0xb0   :  { %v192_v22 = vpop.f32.mrf.mxu0  ;;  %v208_v23 = vpop.f32.mrf.mxu1 }
  0xb1   :  { %v193_v24 = vadd.f32 %v414_v21, %v192_v22  ;;  %v209_v25 = vadd.f32 %v414_v21, %v208_v23 }
  0xb3   :  { %196 = vst [vmem:[#allocation2] sm:$0xff] %v193_v24 }
  0xb4   :  { %212 = vst [vmem:[#allocation2 + $0x8] sm:$0xff] %v209_v25 }
  0xb8   :  { %v194_v26 = vpop.f32.mrf.mxu0  ;;  %v210_v27 = vpop.f32.mrf.mxu1 }
  0xbb   :  { %v213_v29 = vld [vmem:[#allocation2 + $0x6] sm:$0xff] }
  0xbc   :  { %v214_v30 = vmax.f32 %v213_v29, 0.0  ;;  %v219_v33 = vld [vmem:[#allocation2 + $0x7] sm:$0xff] }
  0xbe   :  { %v218_v31 = vmul.f32 %v415_v28, %v214_v30 }
  0xc0   :  { %v220_v32 = vpack.c.bf16 %v218_v31, %v218_v31 }
  0xc2   :  { %277 = vmatmul.bf16.vlgmr.msra.gmra.mxu2 %v220_v32 }
 0x145   :  { %v278_v34 = vpop.f32.mrf.mxu2 }
 0x146   :  { %v279_v35 = vadd.f32 %v278_v34, %v219_v33 }
 0x148   :  { %v282_v36 = vmax.f32 %v279_v35, 0.0 }
 0x14a   :  { %v283_v37 = vsub.f32 %v282_v36, %v218_v31 }
 0x14c   :  { %v284_v38 = vmul.f32 %v415_v28, %v283_v37 }
 0x14d   :  { %v280_v39 = vpop.f32.mrf.mxu2 }
 0x14e   :  { %v285_v40 = vadd.f32 %v284_v38, %v218_v31 }
 0x150   :  { %v287_v41 = vpack.c.bf16 %v285_v40, %v285_v40 }
 0x152   :  { %296 = vmatmul.bf16.vlgmr.msra.gmra.mxu3 %v287_v41 }
 0x1d5   :  { %v297_v42 = vpop.f32.mrf.mxu3 }
 0x1d6   :  { %v298_v43 = vadd.f32 %v297_v42, %v209_v25 }
 0x1d8   :  { %v301_v44 = vmax.f32 %v298_v43, 0.0 }
 0x1da   :  { %v302_v45 = vsub.f32 %v301_v44, %v285_v40 }
 0x1dc   :  { %v303_v46 = vmul.f32 %v415_v28, %v302_v45 }
 0x1dd   :  { %v299_v47 = vpop.f32.mrf.mxu3 }
 0x1de   :  { %v304_v48 = vadd.f32 %v303_v46, %v285_v40 }
 0x1e0   :  { %305 = vst [vmem:[#allocation11] sm:$0xff] %v304_v48 }
 0x1e1   :  { %316 = dma.vmem_to_hbm [thread:$0]  %s312_s5, 128, %s314_s21, [#allocation5]  }
 0x1e2   :  { %542 = dma.done.wait [#allocation5], 128  }
 0x1e3   :  { %543 = vsyncadd [#allocation5], 4294967168 }
 0x1e4   :  { %321 = vsyncpa [#allocation4], 1 }
 0x1e5   :  { %322 = vsyncpa [#allocation7], 1 }
 0x1e6   :  { %323 = vsyncpa [#allocation10], 1 }
 0x1e7   :  { %324 = vsyncpa [#allocation5], 1 }

</bundles_post_ra>
